<compile_context>
chip_gen: v7x
topology: tpu7x:2x2x1
jax: 0.10.0
libtpu: 0.0.40
codegen_flags: <defaults>
</compile_context>

<pallas_src>
import functools

import numpy as np

import jax
import jax.numpy as jnp
from jax.experimental import pallas as pl
from jax.experimental.pallas import tpu as pltpu


def _round_up(x, m):
    return (x + m - 1) // m * m


# ----------------------------------------------------------------------------
# Kernel: one grid step = one lane block of batch_block images, 2 fused convs.
# ----------------------------------------------------------------------------
def basic_block_kernel(tap_offsets, masked_taps, compute_dtype,
                       x_ref, w1_ref, wd_ref, w2_ref, b1_ref, b2_ref,
                       mask_ref, o_ref):
    L = x_ref.shape[-1]                       # bb * H*W lanes in this block

    x = x_ref[...].astype(compute_dtype)      # (Cin_p, L), cast BEFORE rolls
    masks = mask_ref[...]                     # (9, L) {0,1} in compute dtype

    def taps(v):
        # Yields the 9 masked, shifted taps of v (each (C, L)); the masks zero
        # every lane whose source row/col is outside its own image, so lanes
        # that roll-wrap across image / block boundaries never contribute.
        for t, off in enumerate(tap_offsets):
            shifted = v if off == 0 else pltpu.roll(v, shift=(-off) % L, axis=1)
            if masked_taps[t]:                # center tap mask is all ones
                shifted = shifted * masks[t:t + 1, :]
            yield t, shifted

    # conv1 (3x3) + bn1 (folded) + relu: K-split accumulation over the 9 taps.
    acc1 = None
    for t, tap in taps(x):
        d = jnp.dot(w1_ref[t], tap, preferred_element_type=jnp.float32)
        acc1 = d if acc1 is None else acc1 + d
    h = jnp.maximum(acc1 + b1_ref[...], 0.0)          # bias broadcast once

    # conv2 (3x3) + bn2, fused with the 1x1 downsample + bn_d (residual) and
    # the trailing relu.  The downsample matmul seeds the accumulator.
    acc2 = jnp.dot(wd_ref[...], x, preferred_element_type=jnp.float32)
    hc = h.astype(compute_dtype)
    for t, tap in taps(hc):
        acc2 = acc2 + jnp.dot(w2_ref[t], tap, preferred_element_type=jnp.float32)

    # (Cout, L): lane-dense, unmasked stores.
    o_ref[...] = jnp.maximum(acc2 + b2_ref[...], 0.0).astype(o_ref.dtype)


# ----------------------------------------------------------------------------
# Wrapper: NCHW in / NCHW out, BN folding, per-tap fused weights, BlockSpecs.
# ----------------------------------------------------------------------------
def basic_block_pallas(x_nchw, params, *, eps=1e-5, batch_block=None,
                       compute_dtype=jnp.bfloat16):
    N, Cin, H, W = x_nchw.shape
    Cout = params["w1"].shape[0]
    P = H * W
    assert P % 128 == 0, "flattened spatial dim must be lane aligned"
    assert Cout % 8 == 0, "planes must be a multiple of 8 (sublane count)"
    Cin_p = _round_up(Cin, 8)

    c_dtype = jnp.dtype(compute_dtype)
    c_bytes = c_dtype.itemsize
    x_bytes = jnp.dtype(x_nchw.dtype).itemsize
    o_bytes = x_bytes

    # ---- batch-block (lane-block) selection ---------------------------------
    # Per-image contribution to the per-step VMEM footprint: double-buffered
    # in/out blocks + casted copies + f32 accumulators + a few live taps.
    per_img = P * (2 * Cin_p * x_bytes + 2 * Cout * o_bytes
                   + (Cin_p + Cout) * c_bytes
                   + 2 * Cout * 4
                   + 2 * Cin_p * c_bytes)
    if batch_block is None:
        vmem_budget = 24 << 20            # stays under v7x's smaller VMEM
        io_target = 4 << 20               # want MB-scale (not KB) step blocks
        bb = min(max(1, vmem_budget // per_img),
                 max(1, io_target // (P * (Cin_p * x_bytes + Cout * o_bytes))))
        bb = min(bb, max(N // 2, 1))      # keep grid >= 2 steps (v7x: 2 TCs)
        while N % bb:
            bb -= 1
        batch_block = max(1, bb)
    assert N % batch_block == 0
    bb = batch_block
    L = bb * P

    # ---- fold eval-mode BatchNorm into weights / bias ------------------------
    def fold_bn(gamma, beta, mean, var):
        scale = gamma * jax.lax.rsqrt(var + eps)
        return scale, beta - mean * scale

    s1, b1 = fold_bn(params["g1"], params["be1"], params["m1"], params["v1"])
    s2, b2 = fold_bn(params["g2"], params["be2"], params["m2"], params["v2"])
    sd, bd = fold_bn(params["gd"], params["bed"], params["md"], params["vd"])

    # Zero-pad input channels to a multiple of 8 (padded channels have zero
    # weights, so results are unchanged).
    w1_p = jnp.pad(params["w1"], ((0, 0), (0, Cin_p - Cin), (0, 0), (0, 0)))
    wd_p = jnp.pad(params["wd"][:, :, 0, 0], ((0, 0), (0, Cin_p - Cin)))

    # OIHW -> per-tap weights (9, Cout, Cin), tap index t = kh*3 + kw,
    # matching the in-kernel tap loop.  BN scales folded in, pre-cast to the
    # matmul compute dtype.
    w1f = (s1[None, :, None]
           * jnp.transpose(w1_p, (2, 3, 0, 1)).reshape(9, Cout, Cin_p)
           ).astype(c_dtype)
    w2f = (s2[None, :, None]
           * jnp.transpose(params["w2"], (2, 3, 0, 1)).reshape(9, Cout, Cout)
           ).astype(c_dtype)
    wdf = (sd[:, None] * wd_p).astype(c_dtype)           # (Cout, Cin_p)
    b1f = b1[:, None].astype(jnp.float32)                 # (Cout, 1)
    b2f = (b2 + bd)[:, None].astype(jnp.float32)          # (Cout, 1)

    # ---- lane masks + flat lane offsets for the 9 taps (static, via numpy) ---
    yy = np.arange(H)[:, None]
    xx = np.arange(W)[None, :]
    mask_rows, tap_offsets, masked_taps = [], [], []
    for kh in range(3):
        for kw in range(3):
            dh, dw = kh - 1, kw - 1
            valid = ((yy + dh >= 0) & (yy + dh < H) &
                     (xx + dw >= 0) & (xx + dw < W))
            mask_rows.append(valid.reshape(P).astype(np.float32))
            tap_offsets.append(dh * W + dw)
            masked_taps.append(not bool(valid.all()))     # center tap -> False
    masks_np = np.tile(np.stack(mask_rows), (1, bb))       # (9, bb*P) per-image
    masks = jnp.asarray(masks_np, dtype=c_dtype)
    tap_offsets = tuple(tap_offsets)
    masked_taps = tuple(masked_taps)

    # ---- channels-on-sublanes, lane-packed images: (Cin_p, N*P) --------------
    x_flat = jnp.pad(x_nchw.reshape(N, Cin, P),
                     ((0, 0), (0, Cin_p - Cin), (0, 0)))
    x_cl = jnp.transpose(x_flat, (1, 0, 2)).reshape(Cin_p, N * P)

    kernel = functools.partial(basic_block_kernel, tap_offsets, masked_taps,
                               compute_dtype)

    # ---- advisory cost + explicit VMEM limit ---------------------------------
    flops = int(2 * N * P * Cout * (9 * Cin_p + 9 * Cout + Cin_p)
                + 6 * N * P * Cout)
    bytes_accessed = int(x_bytes * Cin_p * N * P + o_bytes * Cout * N * P
                         + c_bytes * (w1f.size + w2f.size + wdf.size
                                      + masks.size)
                         + 4 * (b1f.size + b2f.size))
    vmem_est = int(bb * per_img
                   + 2 * c_bytes * (w1f.size + w2f.size + wdf.size + masks.size)
                   + 8 * (b1f.size + b2f.size)
                   + (2 << 20))
    vmem_limit = int(min(max(vmem_est, 16 << 20), 48 << 20))

    out_cl = pl.pallas_call(
        kernel,
        out_shape=jax.ShapeDtypeStruct((Cout, N * P), x_nchw.dtype),
        grid=(N // bb,),
        in_specs=[
            pl.BlockSpec((Cin_p, L), lambda n: (0, n)),
            pl.BlockSpec((9, Cout, Cin_p), lambda n: (0, 0, 0)),
            pl.BlockSpec((Cout, Cin_p), lambda n: (0, 0)),
            pl.BlockSpec((9, Cout, Cout), lambda n: (0, 0, 0)),
            pl.BlockSpec((Cout, 1), lambda n: (0, 0)),
            pl.BlockSpec((Cout, 1), lambda n: (0, 0)),
            pl.BlockSpec((9, L), lambda n: (0, 0)),
        ],
        out_specs=pl.BlockSpec((Cout, L), lambda n: (0, n)),
        compiler_params=pltpu.CompilerParams(
            dimension_semantics=("parallel",),      # both v7x TCs stay busy
            vmem_limit_bytes=vmem_limit),
        cost_estimate=pl.CostEstimate(flops=flops, transcendentals=0,
                                      bytes_accessed=bytes_accessed),
    )(x_cl, w1f, wdf, w2f, b1f, b2f, masks)

    # (Cout, N*P) -> NCHW
    out = jnp.transpose(out_cl.reshape(Cout, N, P), (1, 0, 2))
    return out.reshape(N, Cout, H, W)


# ----------------------------------------------------------------------------
# Pure-JAX reference (mirrors the PyTorch module in eval mode).
# ----------------------------------------------------------------------------
def basic_block_ref(x, p, eps=1e-5):
    def conv(x, w, pad):
        return jax.lax.conv_general_dilated(
            x, w, window_strides=(1, 1), padding=((pad, pad), (pad, pad)),
            dimension_numbers=("NCHW", "OIHW", "NCHW"))

    def bn(x, g, b, m, v):
        g, b, m, v = (a.reshape(1, -1, 1, 1) for a in (g, b, m, v))
        return (x - m) * jax.lax.rsqrt(v + eps) * g + b

    out = conv(x, p["w1"], 1)
    out = jnp.maximum(bn(out, p["g1"], p["be1"], p["m1"], p["v1"]), 0.0)
    out = conv(out, p["w2"], 1)
    out = bn(out, p["g2"], p["be2"], p["m2"], p["v2"])
    ident = conv(x, p["wd"], 0)
    ident = bn(ident, p["gd"], p["bed"], p["md"], p["vd"])
    return jnp.maximum(out + ident, 0.0)


def make_params(key, in_planes, planes):
    ks = jax.random.split(key, 12)
    return {
        "w1": jax.random.normal(ks[0], (planes, in_planes, 3, 3), jnp.float32) * 0.1,
        "w2": jax.random.normal(ks[1], (planes, planes, 3, 3), jnp.float32) * 0.1,
        "wd": jax.random.normal(ks[2], (planes, in_planes, 1, 1), jnp.float32) * 0.1,
        "g1": jax.random.uniform(ks[3], (planes,), jnp.float32, 0.5, 1.5),
        "be1": jax.random.normal(ks[4], (planes,), jnp.float32) * 0.1,
        "m1": jax.random.normal(ks[5], (planes,), jnp.float32) * 0.1,
        "v1": jax.random.uniform(ks[6], (planes,), jnp.float32, 0.5, 1.5),
        "g2": jax.random.uniform(ks[7], (planes,), jnp.float32, 0.5, 1.5),
        "be2": jax.random.normal(ks[8], (planes,), jnp.float32) * 0.1,
        "m2": jax.random.normal(ks[9], (planes,), jnp.float32) * 0.1,
        "v2": jax.random.uniform(ks[10], (planes,), jnp.float32, 0.5, 1.5),
        "gd": jax.random.uniform(ks[11], (planes,), jnp.float32, 0.5, 1.5),
        "bed": jax.random.normal(ks[4], (planes,), jnp.float32) * 0.05,
        "md": jax.random.normal(ks[5], (planes,), jnp.float32) * 0.05,
        "vd": jax.random.uniform(ks[6], (planes,), jnp.float32, 0.5, 1.5),
    }


if __name__ == "__main__":
    # stride=1, in_planes != planes -> downsample branch present
    N, in_planes, planes, H, W = 2, 4, 8, 16, 16
    key = jax.random.PRNGKey(0)
    kx, kp = jax.random.split(key)
    x = jax.random.normal(kx, (N, in_planes, H, W), jnp.float32)
    params = make_params(kp, in_planes, planes)

    ref = jax.block_until_ready(basic_block_ref(x, params))

    # f32 compute path: bit-for-bit-ish correctness of the fused structure.
    out_f32 = jax.block_until_ready(
        basic_block_pallas(x, params, compute_dtype=jnp.float32))
    assert out_f32.shape == (N, planes, H, W), out_f32.shape
    assert jnp.allclose(out_f32, ref, rtol=1e-4, atol=1e-4), \
        float(jnp.max(jnp.abs(out_f32 - ref)))

    # Default bf16 MXU-operand path (performance config); looser tolerance.
    out_bf16 = jax.block_until_ready(basic_block_pallas(x, params))
    assert out_bf16.shape == (N, planes, H, W), out_bf16.shape
    assert jnp.allclose(out_bf16, ref, rtol=5e-2, atol=5e-2), \
        float(jnp.max(jnp.abs(out_bf16 - ref)))

    print("KERNEL_OK")
</pallas_src>

<mosaic_0001>
module attributes {stable_mosaic.version = 11 : i64} {
  func.func @basic_block_kernel(%arg0: i32, %arg1: memref<8x256xf32, #tpu.memory_space<vmem>>, %arg2: memref<9x8x8xf32, #tpu.memory_space<vmem>>, %arg3: memref<8x8xf32, #tpu.memory_space<vmem>>, %arg4: memref<9x8x8xf32, #tpu.memory_space<vmem>>, %arg5: memref<8x1xf32, #tpu.memory_space<vmem>>, %arg6: memref<8x1xf32, #tpu.memory_space<vmem>>, %arg7: memref<9x256xf32, #tpu.memory_space<vmem>>, %arg8: memref<8x256xf32, #tpu.memory_space<vmem>>) attributes {dimension_semantics = [#tpu.dimension_semantics<parallel>], iteration_bounds = array<i64: 2>, scalar_prefetch = 0 : i64, scratch_operands = 0 : i64, tpu.core_type = #tpu.core_type<tc>, window_params = [{transform_indices = @transform_0, window_bounds = array<i64: 8, 256>}, {pipeline_mode = #tpu.pipeline_mode<synchronous>, transform_indices = @transform_1, window_bounds = array<i64: 9, 8, 8>}, {pipeline_mode = #tpu.pipeline_mode<synchronous>, transform_indices = @transform_2, window_bounds = array<i64: 8, 8>}, {pipeline_mode = #tpu.pipeline_mode<synchronous>, transform_indices = @transform_3, window_bounds = array<i64: 9, 8, 8>}, {pipeline_mode = #tpu.pipeline_mode<synchronous>, transform_indices = @transform_4, window_bounds = array<i64: 8, 1>}, {pipeline_mode = #tpu.pipeline_mode<synchronous>, transform_indices = @transform_5, window_bounds = array<i64: 8, 1>}, {pipeline_mode = #tpu.pipeline_mode<synchronous>, transform_indices = @transform_6, window_bounds = array<i64: 9, 256>}, {transform_indices = @transform_7, window_bounds = array<i64: 8, 256>}]} {
    %c0 = arith.constant 0 : index
    %c0_0 = arith.constant 0 : index
    %0 = vector.load %arg1[%c0, %c0_0] : memref<8x256xf32, #tpu.memory_space<vmem>>, vector<8x256xf32>
    %c0_1 = arith.constant 0 : index
    %c0_2 = arith.constant 0 : index
    %1 = vector.load %arg7[%c0_1, %c0_2] : memref<9x256xf32, #tpu.memory_space<vmem>>, vector<9x256xf32>
    %c17_i32 = arith.constant 17 : i32
    %2 = tpu.dynamic_rotate %0 by %c17_i32 dim 1 : vector<8x256xf32>, i32 -> vector<8x256xf32>
    %3 = vector.extract_strided_slice %1 {offsets = [0, 0], sizes = [1, 256], strides = [1, 1]} : vector<9x256xf32> to vector<1x256xf32>
    %4 = vector.broadcast %3 : vector<1x256xf32> to vector<8x256xf32>
    %5 = arith.mulf %2, %4 : vector<8x256xf32>
    %c0_3 = arith.constant 0 : index
    %c0_4 = arith.constant 0 : index
    %c0_5 = arith.constant 0 : index
    %6 = vector.load %arg2[%c0_3, %c0_4, %c0_5] : memref<9x8x8xf32, #tpu.memory_space<vmem>>, vector<1x8x8xf32>
    %7 = vector.shape_cast %6 : vector<1x8x8xf32> to vector<8x8xf32>
    %cst = arith.constant dense<0.000000e+00> : vector<8x256xf32>
    %8 = tpu.matmul %7, %5, %cst {dimension_numbers = #tpu.dot_dimension_numbers<[1], [0], [0], [1], [0, 0, 1, 1], [], []>} : vector<8x8xf32>, vector<8x256xf32>, vector<8x256xf32> -> vector<8x256xf32>
    %c16_i32 = arith.constant 16 : i32
    %9 = tpu.dynamic_rotate %0 by %c16_i32 dim 1 : vector<8x256xf32>, i32 -> vector<8x256xf32>
    %10 = vector.extract_strided_slice %1 {offsets = [1, 0], sizes = [1, 256], strides = [1, 1]} : vector<9x256xf32> to vector<1x256xf32>
    %11 = vector.broadcast %10 : vector<1x256xf32> to vector<8x256xf32>
    %12 = arith.mulf %9, %11 : vector<8x256xf32>
    %c1 = arith.constant 1 : index
    %c0_6 = arith.constant 0 : index
    %c0_7 = arith.constant 0 : index
    %13 = vector.load %arg2[%c1, %c0_6, %c0_7] : memref<9x8x8xf32, #tpu.memory_space<vmem>>, vector<1x8x8xf32>
    %14 = vector.shape_cast %13 : vector<1x8x8xf32> to vector<8x8xf32>
    %cst_8 = arith.constant dense<0.000000e+00> : vector<8x256xf32>
    %15 = tpu.matmul %14, %12, %cst_8 {dimension_numbers = #tpu.dot_dimension_numbers<[1], [0], [0], [1], [0, 0, 1, 1], [], []>} : vector<8x8xf32>, vector<8x256xf32>, vector<8x256xf32> -> vector<8x256xf32>
    %16 = arith.addf %8, %15 : vector<8x256xf32>
    %c15_i32 = arith.constant 15 : i32
    %17 = tpu.dynamic_rotate %0 by %c15_i32 dim 1 : vector<8x256xf32>, i32 -> vector<8x256xf32>
    %18 = vector.extract_strided_slice %1 {offsets = [2, 0], sizes = [1, 256], strides = [1, 1]} : vector<9x256xf32> to vector<1x256xf32>
    %19 = vector.broadcast %18 : vector<1x256xf32> to vector<8x256xf32>
    %20 = arith.mulf %17, %19 : vector<8x256xf32>
    %c2 = arith.constant 2 : index
    %c0_9 = arith.constant 0 : index
    %c0_10 = arith.constant 0 : index
    %21 = vector.load %arg2[%c2, %c0_9, %c0_10] : memref<9x8x8xf32, #tpu.memory_space<vmem>>, vector<1x8x8xf32>
    %22 = vector.shape_cast %21 : vector<1x8x8xf32> to vector<8x8xf32>
    %cst_11 = arith.constant dense<0.000000e+00> : vector<8x256xf32>
    %23 = tpu.matmul %22, %20, %cst_11 {dimension_numbers = #tpu.dot_dimension_numbers<[1], [0], [0], [1], [0, 0, 1, 1], [], []>} : vector<8x8xf32>, vector<8x256xf32>, vector<8x256xf32> -> vector<8x256xf32>
    %24 = arith.addf %16, %23 : vector<8x256xf32>
    %c1_i32 = arith.constant 1 : i32
    %25 = tpu.dynamic_rotate %0 by %c1_i32 dim 1 : vector<8x256xf32>, i32 -> vector<8x256xf32>
    %26 = vector.extract_strided_slice %1 {offsets = [3, 0], sizes = [1, 256], strides = [1, 1]} : vector<9x256xf32> to vector<1x256xf32>
    %27 = vector.broadcast %26 : vector<1x256xf32> to vector<8x256xf32>
    %28 = arith.mulf %25, %27 : vector<8x256xf32>
    %c3 = arith.constant 3 : index
    %c0_12 = arith.constant 0 : index
    %c0_13 = arith.constant 0 : index
    %29 = vector.load %arg2[%c3, %c0_12, %c0_13] : memref<9x8x8xf32, #tpu.memory_space<vmem>>, vector<1x8x8xf32>
    %30 = vector.shape_cast %29 : vector<1x8x8xf32> to vector<8x8xf32>
    %cst_14 = arith.constant dense<0.000000e+00> : vector<8x256xf32>
    %31 = tpu.matmul %30, %28, %cst_14 {dimension_numbers = #tpu.dot_dimension_numbers<[1], [0], [0], [1], [0, 0, 1, 1], [], []>} : vector<8x8xf32>, vector<8x256xf32>, vector<8x256xf32> -> vector<8x256xf32>
    %32 = arith.addf %24, %31 : vector<8x256xf32>
    %c4 = arith.constant 4 : index
    %c0_15 = arith.constant 0 : index
    %c0_16 = arith.constant 0 : index
    %33 = vector.load %arg2[%c4, %c0_15, %c0_16] : memref<9x8x8xf32, #tpu.memory_space<vmem>>, vector<1x8x8xf32>
    %34 = vector.shape_cast %33 : vector<1x8x8xf32> to vector<8x8xf32>
    %cst_17 = arith.constant dense<0.000000e+00> : vector<8x256xf32>
    %35 = tpu.matmul %34, %0, %cst_17 {dimension_numbers = #tpu.dot_dimension_numbers<[1], [0], [0], [1], [0, 0, 1, 1], [], []>} : vector<8x8xf32>, vector<8x256xf32>, vector<8x256xf32> -> vector<8x256xf32>
    %36 = arith.addf %32, %35 : vector<8x256xf32>
    %c255_i32 = arith.constant 255 : i32
    %37 = tpu.dynamic_rotate %0 by %c255_i32 dim 1 : vector<8x256xf32>, i32 -> vector<8x256xf32>
    %38 = vector.extract_strided_slice %1 {offsets = [5, 0], sizes = [1, 256], strides = [1, 1]} : vector<9x256xf32> to vector<1x256xf32>
    %39 = vector.broadcast %38 : vector<1x256xf32> to vector<8x256xf32>
    %40 = arith.mulf %37, %39 : vector<8x256xf32>
    %c5 = arith.constant 5 : index
    %c0_18 = arith.constant 0 : index
    %c0_19 = arith.constant 0 : index
    %41 = vector.load %arg2[%c5, %c0_18, %c0_19] : memref<9x8x8xf32, #tpu.memory_space<vmem>>, vector<1x8x8xf32>
    %42 = vector.shape_cast %41 : vector<1x8x8xf32> to vector<8x8xf32>
    %cst_20 = arith.constant dense<0.000000e+00> : vector<8x256xf32>
    %43 = tpu.matmul %42, %40, %cst_20 {dimension_numbers = #tpu.dot_dimension_numbers<[1], [0], [0], [1], [0, 0, 1, 1], [], []>} : vector<8x8xf32>, vector<8x256xf32>, vector<8x256xf32> -> vector<8x256xf32>
    %44 = arith.addf %36, %43 : vector<8x256xf32>
    %c241_i32 = arith.constant 241 : i32
    %45 = tpu.dynamic_rotate %0 by %c241_i32 dim 1 : vector<8x256xf32>, i32 -> vector<8x256xf32>
    %46 = vector.extract_strided_slice %1 {offsets = [6, 0], sizes = [1, 256], strides = [1, 1]} : vector<9x256xf32> to vector<1x256xf32>
    %47 = vector.broadcast %46 : vector<1x256xf32> to vector<8x256xf32>
    %48 = arith.mulf %45, %47 : vector<8x256xf32>
    %c6 = arith.constant 6 : index
    %c0_21 = arith.constant 0 : index
    %c0_22 = arith.constant 0 : index
    %49 = vector.load %arg2[%c6, %c0_21, %c0_22] : memref<9x8x8xf32, #tpu.memory_space<vmem>>, vector<1x8x8xf32>
    %50 = vector.shape_cast %49 : vector<1x8x8xf32> to vector<8x8xf32>
    %cst_23 = arith.constant dense<0.000000e+00> : vector<8x256xf32>
    %51 = tpu.matmul %50, %48, %cst_23 {dimension_numbers = #tpu.dot_dimension_numbers<[1], [0], [0], [1], [0, 0, 1, 1], [], []>} : vector<8x8xf32>, vector<8x256xf32>, vector<8x256xf32> -> vector<8x256xf32>
    %52 = arith.addf %44, %51 : vector<8x256xf32>
    %c240_i32 = arith.constant 240 : i32
    %53 = tpu.dynamic_rotate %0 by %c240_i32 dim 1 : vector<8x256xf32>, i32 -> vector<8x256xf32>
    %54 = vector.extract_strided_slice %1 {offsets = [7, 0], sizes = [1, 256], strides = [1, 1]} : vector<9x256xf32> to vector<1x256xf32>
    %55 = vector.broadcast %54 : vector<1x256xf32> to vector<8x256xf32>
    %56 = arith.mulf %53, %55 : vector<8x256xf32>
    %c7 = arith.constant 7 : index
    %c0_24 = arith.constant 0 : index
    %c0_25 = arith.constant 0 : index
    %57 = vector.load %arg2[%c7, %c0_24, %c0_25] : memref<9x8x8xf32, #tpu.memory_space<vmem>>, vector<1x8x8xf32>
    %58 = vector.shape_cast %57 : vector<1x8x8xf32> to vector<8x8xf32>
    %cst_26 = arith.constant dense<0.000000e+00> : vector<8x256xf32>
    %59 = tpu.matmul %58, %56, %cst_26 {dimension_numbers = #tpu.dot_dimension_numbers<[1], [0], [0], [1], [0, 0, 1, 1], [], []>} : vector<8x8xf32>, vector<8x256xf32>, vector<8x256xf32> -> vector<8x256xf32>
    %60 = arith.addf %52, %59 : vector<8x256xf32>
    %c239_i32 = arith.constant 239 : i32
    %61 = tpu.dynamic_rotate %0 by %c239_i32 dim 1 : vector<8x256xf32>, i32 -> vector<8x256xf32>
    %62 = vector.extract_strided_slice %1 {offsets = [8, 0], sizes = [1, 256], strides = [1, 1]} : vector<9x256xf32> to vector<1x256xf32>
    %63 = vector.broadcast %62 : vector<1x256xf32> to vector<8x256xf32>
    %64 = arith.mulf %61, %63 : vector<8x256xf32>
    %c8 = arith.constant 8 : index
    %c0_27 = arith.constant 0 : index
    %c0_28 = arith.constant 0 : index
    %65 = vector.load %arg2[%c8, %c0_27, %c0_28] : memref<9x8x8xf32, #tpu.memory_space<vmem>>, vector<1x8x8xf32>
    %66 = vector.shape_cast %65 : vector<1x8x8xf32> to vector<8x8xf32>
    %cst_29 = arith.constant dense<0.000000e+00> : vector<8x256xf32>
    %67 = tpu.matmul %66, %64, %cst_29 {dimension_numbers = #tpu.dot_dimension_numbers<[1], [0], [0], [1], [0, 0, 1, 1], [], []>} : vector<8x8xf32>, vector<8x256xf32>, vector<8x256xf32> -> vector<8x256xf32>
    %68 = arith.addf %60, %67 : vector<8x256xf32>
    %c0_30 = arith.constant 0 : index
    %c0_31 = arith.constant 0 : index
    %69 = vector.load %arg5[%c0_30, %c0_31] : memref<8x1xf32, #tpu.memory_space<vmem>>, vector<8x1xf32>
    %70 = vector.broadcast %69 : vector<8x1xf32> to vector<8x256xf32>
    %71 = arith.addf %68, %70 : vector<8x256xf32>
    %cst_32 = arith.constant 0.000000e+00 : f32
    %72 = vector.broadcast %cst_32 : f32 to vector<8x256xf32>
    %73 = arith.maximumf %71, %72 : vector<8x256xf32>
    %c0_33 = arith.constant 0 : index
    %c0_34 = arith.constant 0 : index
    %74 = vector.load %arg3[%c0_33, %c0_34] : memref<8x8xf32, #tpu.memory_space<vmem>>, vector<8x8xf32>
    %cst_35 = arith.constant dense<0.000000e+00> : vector<8x256xf32>
    %75 = tpu.matmul %74, %0, %cst_35 {dimension_numbers = #tpu.dot_dimension_numbers<[1], [0], [0], [1], [0, 0, 1, 1], [], []>} : vector<8x8xf32>, vector<8x256xf32>, vector<8x256xf32> -> vector<8x256xf32>
    %c17_i32_36 = arith.constant 17 : i32
    %76 = tpu.dynamic_rotate %73 by %c17_i32_36 dim 1 : vector<8x256xf32>, i32 -> vector<8x256xf32>
    %77 = vector.extract_strided_slice %1 {offsets = [0, 0], sizes = [1, 256], strides = [1, 1]} : vector<9x256xf32> to vector<1x256xf32>
    %78 = vector.broadcast %77 : vector<1x256xf32> to vector<8x256xf32>
    %79 = arith.mulf %76, %78 : vector<8x256xf32>
    %c0_37 = arith.constant 0 : index
    %c0_38 = arith.constant 0 : index
    %c0_39 = arith.constant 0 : index
    %80 = vector.load %arg4[%c0_37, %c0_38, %c0_39] : memref<9x8x8xf32, #tpu.memory_space<vmem>>, vector<1x8x8xf32>
    %81 = vector.shape_cast %80 : vector<1x8x8xf32> to vector<8x8xf32>
    %cst_40 = arith.constant dense<0.000000e+00> : vector<8x256xf32>
    %82 = tpu.matmul %81, %79, %cst_40 {dimension_numbers = #tpu.dot_dimension_numbers<[1], [0], [0], [1], [0, 0, 1, 1], [], []>} : vector<8x8xf32>, vector<8x256xf32>, vector<8x256xf32> -> vector<8x256xf32>
    %83 = arith.addf %75, %82 : vector<8x256xf32>
    %c16_i32_41 = arith.constant 16 : i32
    %84 = tpu.dynamic_rotate %73 by %c16_i32_41 dim 1 : vector<8x256xf32>, i32 -> vector<8x256xf32>
    %85 = vector.extract_strided_slice %1 {offsets = [1, 0], sizes = [1, 256], strides = [1, 1]} : vector<9x256xf32> to vector<1x256xf32>
    %86 = vector.broadcast %85 : vector<1x256xf32> to vector<8x256xf32>
    %87 = arith.mulf %84, %86 : vector<8x256xf32>
    %c1_42 = arith.constant 1 : index
    %c0_43 = arith.constant 0 : index
    %c0_44 = arith.constant 0 : index
    %88 = vector.load %arg4[%c1_42, %c0_43, %c0_44] : memref<9x8x8xf32, #tpu.memory_space<vmem>>, vector<1x8x8xf32>
    %89 = vector.shape_cast %88 : vector<1x8x8xf32> to vector<8x8xf32>
    %cst_45 = arith.constant dense<0.000000e+00> : vector<8x256xf32>
    %90 = tpu.matmul %89, %87, %cst_45 {dimension_numbers = #tpu.dot_dimension_numbers<[1], [0], [0], [1], [0, 0, 1, 1], [], []>} : vector<8x8xf32>, vector<8x256xf32>, vector<8x256xf32> -> vector<8x256xf32>
    %91 = arith.addf %83, %90 : vector<8x256xf32>
    %c15_i32_46 = arith.constant 15 : i32
    %92 = tpu.dynamic_rotate %73 by %c15_i32_46 dim 1 : vector<8x256xf32>, i32 -> vector<8x256xf32>
    %93 = vector.extract_strided_slice %1 {offsets = [2, 0], sizes = [1, 256], strides = [1, 1]} : vector<9x256xf32> to vector<1x256xf32>
    %94 = vector.broadcast %93 : vector<1x256xf32> to vector<8x256xf32>
    %95 = arith.mulf %92, %94 : vector<8x256xf32>
    %c2_47 = arith.constant 2 : index
    %c0_48 = arith.constant 0 : index
    %c0_49 = arith.constant 0 : index
    %96 = vector.load %arg4[%c2_47, %c0_48, %c0_49] : memref<9x8x8xf32, #tpu.memory_space<vmem>>, vector<1x8x8xf32>
    %97 = vector.shape_cast %96 : vector<1x8x8xf32> to vector<8x8xf32>
    %cst_50 = arith.constant dense<0.000000e+00> : vector<8x256xf32>
    %98 = tpu.matmul %97, %95, %cst_50 {dimension_numbers = #tpu.dot_dimension_numbers<[1], [0], [0], [1], [0, 0, 1, 1], [], []>} : vector<8x8xf32>, vector<8x256xf32>, vector<8x256xf32> -> vector<8x256xf32>
    %99 = arith.addf %91, %98 : vector<8x256xf32>
    %c1_i32_51 = arith.constant 1 : i32
    %100 = tpu.dynamic_rotate %73 by %c1_i32_51 dim 1 : vector<8x256xf32>, i32 -> vector<8x256xf32>
    %101 = vector.extract_strided_slice %1 {offsets = [3, 0], sizes = [1, 256], strides = [1, 1]} : vector<9x256xf32> to vector<1x256xf32>
    %102 = vector.broadcast %101 : vector<1x256xf32> to vector<8x256xf32>
    %103 = arith.mulf %100, %102 : vector<8x256xf32>
    %c3_52 = arith.constant 3 : index
    %c0_53 = arith.constant 0 : index
    %c0_54 = arith.constant 0 : index
    %104 = vector.load %arg4[%c3_52, %c0_53, %c0_54] : memref<9x8x8xf32, #tpu.memory_space<vmem>>, vector<1x8x8xf32>
    %105 = vector.shape_cast %104 : vector<1x8x8xf32> to vector<8x8xf32>
    %cst_55 = arith.constant dense<0.000000e+00> : vector<8x256xf32>
    %106 = tpu.matmul %105, %103, %cst_55 {dimension_numbers = #tpu.dot_dimension_numbers<[1], [0], [0], [1], [0, 0, 1, 1], [], []>} : vector<8x8xf32>, vector<8x256xf32>, vector<8x256xf32> -> vector<8x256xf32>
    %107 = arith.addf %99, %106 : vector<8x256xf32>
    %c4_56 = arith.constant 4 : index
    %c0_57 = arith.constant 0 : index
    %c0_58 = arith.constant 0 : index
    %108 = vector.load %arg4[%c4_56, %c0_57, %c0_58] : memref<9x8x8xf32, #tpu.memory_space<vmem>>, vector<1x8x8xf32>
    %109 = vector.shape_cast %108 : vector<1x8x8xf32> to vector<8x8xf32>
    %cst_59 = arith.constant dense<0.000000e+00> : vector<8x256xf32>
    %110 = tpu.matmul %109, %73, %cst_59 {dimension_numbers = #tpu.dot_dimension_numbers<[1], [0], [0], [1], [0, 0, 1, 1], [], []>} : vector<8x8xf32>, vector<8x256xf32>, vector<8x256xf32> -> vector<8x256xf32>
    %111 = arith.addf %107, %110 : vector<8x256xf32>
    %c255_i32_60 = arith.constant 255 : i32
    %112 = tpu.dynamic_rotate %73 by %c255_i32_60 dim 1 : vector<8x256xf32>, i32 -> vector<8x256xf32>
    %113 = vector.extract_strided_slice %1 {offsets = [5, 0], sizes = [1, 256], strides = [1, 1]} : vector<9x256xf32> to vector<1x256xf32>
    %114 = vector.broadcast %113 : vector<1x256xf32> to vector<8x256xf32>
    %115 = arith.mulf %112, %114 : vector<8x256xf32>
    %c5_61 = arith.constant 5 : index
    %c0_62 = arith.constant 0 : index
    %c0_63 = arith.constant 0 : index
    %116 = vector.load %arg4[%c5_61, %c0_62, %c0_63] : memref<9x8x8xf32, #tpu.memory_space<vmem>>, vector<1x8x8xf32>
    %117 = vector.shape_cast %116 : vector<1x8x8xf32> to vector<8x8xf32>
    %cst_64 = arith.constant dense<0.000000e+00> : vector<8x256xf32>
    %118 = tpu.matmul %117, %115, %cst_64 {dimension_numbers = #tpu.dot_dimension_numbers<[1], [0], [0], [1], [0, 0, 1, 1], [], []>} : vector<8x8xf32>, vector<8x256xf32>, vector<8x256xf32> -> vector<8x256xf32>
    %119 = arith.addf %111, %118 : vector<8x256xf32>
    %c241_i32_65 = arith.constant 241 : i32
    %120 = tpu.dynamic_rotate %73 by %c241_i32_65 dim 1 : vector<8x256xf32>, i32 -> vector<8x256xf32>
    %121 = vector.extract_strided_slice %1 {offsets = [6, 0], sizes = [1, 256], strides = [1, 1]} : vector<9x256xf32> to vector<1x256xf32>
    %122 = vector.broadcast %121 : vector<1x256xf32> to vector<8x256xf32>
    %123 = arith.mulf %120, %122 : vector<8x256xf32>
    %c6_66 = arith.constant 6 : index
    %c0_67 = arith.constant 0 : index
    %c0_68 = arith.constant 0 : index
    %124 = vector.load %arg4[%c6_66, %c0_67, %c0_68] : memref<9x8x8xf32, #tpu.memory_space<vmem>>, vector<1x8x8xf32>
    %125 = vector.shape_cast %124 : vector<1x8x8xf32> to vector<8x8xf32>
    %cst_69 = arith.constant dense<0.000000e+00> : vector<8x256xf32>
    %126 = tpu.matmul %125, %123, %cst_69 {dimension_numbers = #tpu.dot_dimension_numbers<[1], [0], [0], [1], [0, 0, 1, 1], [], []>} : vector<8x8xf32>, vector<8x256xf32>, vector<8x256xf32> -> vector<8x256xf32>
    %127 = arith.addf %119, %126 : vector<8x256xf32>
    %c240_i32_70 = arith.constant 240 : i32
    %128 = tpu.dynamic_rotate %73 by %c240_i32_70 dim 1 : vector<8x256xf32>, i32 -> vector<8x256xf32>
    %129 = vector.extract_strided_slice %1 {offsets = [7, 0], sizes = [1, 256], strides = [1, 1]} : vector<9x256xf32> to vector<1x256xf32>
    %130 = vector.broadcast %129 : vector<1x256xf32> to vector<8x256xf32>
    %131 = arith.mulf %128, %130 : vector<8x256xf32>
    %c7_71 = arith.constant 7 : index
    %c0_72 = arith.constant 0 : index
    %c0_73 = arith.constant 0 : index
    %132 = vector.load %arg4[%c7_71, %c0_72, %c0_73] : memref<9x8x8xf32, #tpu.memory_space<vmem>>, vector<1x8x8xf32>
    %133 = vector.shape_cast %132 : vector<1x8x8xf32> to vector<8x8xf32>
    %cst_74 = arith.constant dense<0.000000e+00> : vector<8x256xf32>
    %134 = tpu.matmul %133, %131, %cst_74 {dimension_numbers = #tpu.dot_dimension_numbers<[1], [0], [0], [1], [0, 0, 1, 1], [], []>} : vector<8x8xf32>, vector<8x256xf32>, vector<8x256xf32> -> vector<8x256xf32>
    %135 = arith.addf %127, %134 : vector<8x256xf32>
    %c239_i32_75 = arith.constant 239 : i32
    %136 = tpu.dynamic_rotate %73 by %c239_i32_75 dim 1 : vector<8x256xf32>, i32 -> vector<8x256xf32>
    %137 = vector.extract_strided_slice %1 {offsets = [8, 0], sizes = [1, 256], strides = [1, 1]} : vector<9x256xf32> to vector<1x256xf32>
    %138 = vector.broadcast %137 : vector<1x256xf32> to vector<8x256xf32>
    %139 = arith.mulf %136, %138 : vector<8x256xf32>
    %c8_76 = arith.constant 8 : index
    %c0_77 = arith.constant 0 : index
    %c0_78 = arith.constant 0 : index
    %140 = vector.load %arg4[%c8_76, %c0_77, %c0_78] : memref<9x8x8xf32, #tpu.memory_space<vmem>>, vector<1x8x8xf32>
    %141 = vector.shape_cast %140 : vector<1x8x8xf32> to vector<8x8xf32>
    %cst_79 = arith.constant dense<0.000000e+00> : vector<8x256xf32>
    %142 = tpu.matmul %141, %139, %cst_79 {dimension_numbers = #tpu.dot_dimension_numbers<[1], [0], [0], [1], [0, 0, 1, 1], [], []>} : vector<8x8xf32>, vector<8x256xf32>, vector<8x256xf32> -> vector<8x256xf32>
    %143 = arith.addf %135, %142 : vector<8x256xf32>
    %c0_80 = arith.constant 0 : index
    %c0_81 = arith.constant 0 : index
    %144 = vector.load %arg6[%c0_80, %c0_81] : memref<8x1xf32, #tpu.memory_space<vmem>>, vector<8x1xf32>
    %145 = vector.broadcast %144 : vector<8x1xf32> to vector<8x256xf32>
    %146 = arith.addf %143, %145 : vector<8x256xf32>
    %cst_82 = arith.constant 0.000000e+00 : f32
    %147 = vector.broadcast %cst_82 : f32 to vector<8x256xf32>
    %148 = arith.maximumf %146, %147 : vector<8x256xf32>
    %c0_83 = arith.constant 0 : index
    %c0_84 = arith.constant 0 : index
    %149 = vector.load %arg8[%c0_83, %c0_84] : memref<8x256xf32, #tpu.memory_space<vmem>>, vector<8x256xf32>
    tpu.vector_store %arg8[%c0_83, %c0_84], %148 {strides = array<i32>} : memref<8x256xf32, #tpu.memory_space<vmem>>, vector<8x256xf32>,
    return
  }
  func.func @transform_0(%arg0: i32) -> (i32, i32) {
    %c0_i32 = arith.constant 0 : i32
    %c0_i32_0 = arith.constant 0 : i32
    return %c0_i32, %arg0 : i32, i32
  }
  func.func @transform_1(%arg0: i32) -> (i32, i32, i32) {
    %c0_i32 = arith.constant 0 : i32
    %c0_i32_0 = arith.constant 0 : i32
    %c0_i32_1 = arith.constant 0 : i32
    %c0_i32_2 = arith.constant 0 : i32
    return %c0_i32, %c0_i32_0, %c0_i32_1 : i32, i32, i32
  }
  func.func @transform_2(%arg0: i32) -> (i32, i32) {
    %c0_i32 = arith.constant 0 : i32
    %c0_i32_0 = arith.constant 0 : i32
    %c0_i32_1 = arith.constant 0 : i32
    return %c0_i32, %c0_i32_0 : i32, i32
  }
  func.func @transform_3(%arg0: i32) -> (i32, i32, i32) {
    %c0_i32 = arith.constant 0 : i32
    %c0_i32_0 = arith.constant 0 : i32
    %c0_i32_1 = arith.constant 0 : i32
    %c0_i32_2 = arith.constant 0 : i32
    return %c0_i32, %c0_i32_0, %c0_i32_1 : i32, i32, i32
  }
  func.func @transform_4(%arg0: i32) -> (i32, i32) {
    %c0_i32 = arith.constant 0 : i32
    %c0_i32_0 = arith.constant 0 : i32
    %c0_i32_1 = arith.constant 0 : i32
    return %c0_i32, %c0_i32_0 : i32, i32
  }
  func.func @transform_5(%arg0: i32) -> (i32, i32) {
    %c0_i32 = arith.constant 0 : i32
    %c0_i32_0 = arith.constant 0 : i32
    %c0_i32_1 = arith.constant 0 : i32
    return %c0_i32, %c0_i32_0 : i32, i32
  }
  func.func @transform_6(%arg0: i32) -> (i32, i32) {
    %c0_i32 = arith.constant 0 : i32
    %c0_i32_0 = arith.constant 0 : i32
    %c0_i32_1 = arith.constant 0 : i32
    return %c0_i32, %c0_i32_0 : i32, i32
  }
  func.func @transform_7(%arg0: i32) -> (i32, i32) {
    %c0_i32 = arith.constant 0 : i32
    %c0_i32_0 = arith.constant 0 : i32
    return %c0_i32, %arg0 : i32, i32
  }
}

</mosaic_0001>

<bundles_post_ra>
// kernel: tpu_custom_call.1
= control target key start
LH: loop header
LB: loop body
LE: loop exit
PB: predicated region body
PF: predicated region fallthrough
CT: control target
= control target key end

     0   :  { %12 = vsyncpa [#allocation3], 0  ;;  %s2760_s0 = inlined_call_operand.vmem [shape: f32[8,512], index: 0, kind: input, shape index: {}]   ;;  %s2761_s1 = inlined_call_operand.vmem [shape: f32[9,8,8], index: 1, kind: input, shape index: {}]   ;;  %s2762_s2 = inlined_call_operand.vmem [shape: f32[8,8], index: 2, kind: input, shape index: {}]   ;;  %s2763_s3 = inlined_call_operand.vmem [shape: f32[9,8,8], index: 3, kind: input, shape index: {}]   ;;  %s2764_s4 = inlined_call_operand.vmem [shape: f32[8,1], index: 4, kind: input, shape index: {}]   ;;  %s2765_s5 = inlined_call_operand.vmem [shape: f32[8,1], index: 5, kind: input, shape index: {}]   ;;  %s2766_s6 = inlined_call_operand.vmem [shape: f32[9,256], index: 6, kind: input, shape index: {}]   ;;  %s2767_s7 = inlined_call_operand.hbm [shape: f32[8,512], index: 7, kind: output, shape index: {}]  }
   0x1   :  { %14 = vsyncpa [#allocation3 + $0x1], 0  ;;  %s2305_s24 = smov 0   ;;  %s2307_s25 = smov 0  }
   0x2   :  { %s2309_s26 = smov 0   ;;  %s2311_s27 = smov 0  }
   0x3 LB: > { %s2326_s28 = sadd.s32 4294967295, %s2252_s27   ;;  %s2056_s29 = sadd.s32 4294967294, %s2252_s27   ;;  %s2252_s27 = sphi %s2311_s27, %s2773_s27   ;;  %s2248_s26 = sphi %s2309_s26, %s2772_s26   ;;  %s2244_s25 = sphi %s2307_s25, %s2771_s25   ;;  %s2240_s24 = sphi %s2305_s24, %s2770_s24  }
   0x4   : > { %s2330_s30 = sadd.s32 1, %s2252_s27   ;;  %s179_s8 = sadd.s32 1, %s2248_s26 }
   0x5   : > { %s176_s9 = ssub.s32 %s2252_s27, %s2330_s30  ;;  %p189_p0 = scmp.ne.s32.totalorder %s2248_s26, %s2244_s25 }
   0x6   : > { %p177_p1 = scmp.eq.s32.totalorder %s176_s9, 0  ;;  %p190_p2 = scmp.eq.s32.totalorder %s2326_s28, 1 }
   0x7   : > { %p195_p3 = scmp.ne.s32.totalorder %s2244_s25, %s2240_s24  ;;  %p196_p4 = scmp.eq.s32.totalorder %s2056_s29, 1 }
   0x8   : > { %s2341_s10 = scalar_select %p177_p1, %s2248_s26, %s179_s8  }
   0x9   : > { %p2343_p5 = por %p190_p2, %p189_p0  ;;  %p2347_p6 = por %p196_p4, %p195_p3 }
   0xa   : > { %p2059_p7 = scmp.ge.s32.totalorder %s2252_s27, 1  ;;  %p241_p8 = scmp.lt.s32.totalorder %s2252_s27, 3 }
   0xc   : > { %p242_p9 = pnand %p2059_p7, %p241_p8 }
   0xd   : > { %s2061_s13 = sshll.u32 (!%p242_p9), %s2326_s28, 1  ;;  %v2254_v0 = vmov (!%p242_p9), 0.0   ;;  %s2255_s18 = smov (!%p242_p9), 17   ;;  %v1122_v3 = vld [vmem:[%s2764_s4] sm:$0xff] (!%p242_p9)  ;;  %v2263_v4 = vmov (!%p242_p9), 0   ;;  %v290_v5 = vlaneseq (!%p242_p9)  ;;  %v2412_v11 = vld [vmem:[%s2766_s6 + $0x8] sm:$0xff] (!%p242_p9) }
   0xe   : > { %245 = sbr.rel (%p242_p9) target bundleno = 856 (0x358), region = 48  ;;  %p274_p10 = scmp.lt.s32.totalorder (!%p242_p9), %s2061_s13, 3  ;;  %393 = vmatprep.mubr.f32.mxu0 (!%p242_p9), %v2254_v0  ;;  %1209 = vmatprep.mubr.f32.mxu1 (!%p242_p9), %v2254_v0  ;;  %v2407_v10 = vld [vmem:[%s2766_s6] sm:$0xff] (!%p242_p9)  ;;  %v2063_v30 = vld [vmem:[%s2761_s1 + $0x8] sm:$0xff] (!%p242_p9)  ;;  %vm325_vm3 = vcmask (!%p242_p9), 64512   ;;  %v2066_v48 = vld [vmem:[%s2761_s1 + $0x10] sm:$0xff] (!%p242_p9) }
   0xf   : > { %s2256_s19 = smov (!%p242_p9), 16   ;;  %s2257_s20 = smov (!%p242_p9), 15   ;;  %2189 = vset.pattern.permute.xlu0 (!%p242_p9), %v2263_v4  ;;  %v2398_v6 = vshrl.u32 (!%p242_p9), %v290_v5, 7  ;;  %v2400_v7 = vand.u32 (!%p242_p9), 127, %v290_v5  ;;  %v305_v43 = vld [vmem:[%s2761_s1] sm:$0xff] (!%p242_p9)  ;;  %v2068_v54 = vld [vmem:[%s2761_s1 + $0x18] sm:$0xff] (!%p242_p9) }
  0x10   : > { %s2258_s21 = smov (!%p242_p9), 1   ;;  %s2259_s22 = smov (!%p242_p9), 127  }
  0x11   : > { %s2260_s23 = smov (!%p242_p9), 113   ;;  %s2261_s29 = smov (!%p242_p9), 112   ;;  %v297_v8 = vsub.s32 (!%p242_p9), 0, %v2398_v6  ;;  %v315_v9 = vsub.s32 (!%p242_p9), 1, %v2398_v6  ;;  %vm292_vm0 = vcmp.lt.s32.totalorder (!%p242_p9), %v2400_v7, 17  ;;  %vm310_vm1 = vcmp.lt.s32.totalorder (!%p242_p9), %v2400_v7, 16 }
  0x12   : > { %s2262_s8 = smov (!%p242_p9), 111   ;;  %v483_v17 = vsub.s32 (!%p242_p9), 2, %v2398_v6  ;;  %vm478_vm2 = vcmp.lt.s32.totalorder (!%p242_p9), %v2400_v7, 15  ;;  %v578_v33 = vsub.s32 (!%p242_p9), 3, %v2398_v6  ;;  %vm573_vm4 = vcmp.lt.s32.totalorder (!%p242_p9), %v2400_v7, 1  ;;  %s270_s16 = sand.u32 (!%p242_p9), 1, %s2244_s25  }
  0x13   : > { %v2417_v14 = vrot.slane (!%p242_p9), %v2412_v11, %v297_v8  ;;  %v2420_v15 = vrot.slane (!%p242_p9), %v2412_v11, %v315_v9  ;;  %v2423_v16 = vrot.slane (!%p242_p9), %v2407_v10, %v315_v9  ;;  %v2427_v18 = vrot.slane (!%p242_p9), %v2407_v10, %v297_v8  ;;  %s2105_s9 = sshll.u32 (!%p242_p9), %s2326_s28, 8  ;;  %s2264_s28 = smov (!%p242_p9), [#allocation2]  }
  0x14   : > { %v2442_v28 = vrot.slane (!%p242_p9), %v2412_v11, %v483_v17  ;;  %v2455_v36 = vrot.slane (!%p242_p9), %v2407_v10, %v483_v17  ;;  %v2461_v39 = vrot.slane (!%p242_p9), %v2412_v11, %v578_v33  ;;  %v2472_v45 = vrot.slane (!%p242_p9), %v2407_v10, %v578_v33  ;;  %v2076_v33 = vld [vmem:[%s2761_s1 + $0x38] sm:$0xff] (!%p242_p9) }
  0x15   : > { %s2775_s13 = smov (!%p274_p10, %s2061_s13), 3  ;;  %v751_v49 = vsub.s32 5, %v2398_v6  ;;  %vm746_vm5 = vcmp.lt.s32.totalorder %v2400_v7, 127  ;;  %v846_v56 = vsub.s32 6, %v2398_v6  ;;  %vm841_vm6 = vcmp.lt.s32.totalorder %v2400_v7, 113 }
  0x16   : > { %s2062_s14 = sshll.u32 %s2775_s13, 3  ;;  %v941_v5 = vsub.s32 7, %v2398_v6  ;;  %vm936_vm7 = vcmp.lt.s32.totalorder %v2400_v7, 112  ;;  %vm1031_vm8 = vcmp.lt.s32.totalorder %v2400_v7, 111 }
  0x17   : > { %s277_s17 = scalar_lea.vmem %s2760_s0, %s2062_s14  ;;  %v2487_v52 = vrot.slane %v2412_v11, %v751_v49  ;;  %v2500_v59 = vrot.slane %v2407_v10, %v751_v49  ;;  %v2506_v61 = vrot.slane %v2412_v11, %v846_v56 }
  0x18   : > { %v2359_v1 = vld [vmem:[%s277_s17] sm:$0xff]  ;;  %v2365_v2 = vld [vmem:[%s277_s17 + $0x8] sm:$0xff]  ;;  %v2525_v17 = vrot.slane %v2412_v11, %v941_v5  ;;  %v2537_v11 = vrot.slane %v2407_v10, %v941_v5  ;;  %s2060_s17 = sshll.u32 %s270_s16, 4 }
  0x19   : > { %286 = vrot.lane.b32.xlu1 %v2359_v1, %s2255_s18  ;;  %306 = vrot.lane.b32.xlu0 %v2359_v1, %s2256_s19  ;;  %s272_s13 = scalar_lea.vmem [#allocation2], %s2060_s17 }
  0x1a   : > { %s1997_s14 = sshll.u32 %s272_s13, 4  ;;  %s2720_s14 = int_to_ptr.vmem [resolvable:$true] %s1997_s14 }
  0x1d   : > { %288 = vrot.lane.b32.xlu1 %v2365_v2, %s2255_s18  ;;  %308 = vrot.lane.b32.xlu0 %v2365_v2, %s2256_s19 }
  0x21   : > { %476 = vrot.lane.b32.xlu1 %v2365_v2, %s2257_s20  ;;  %474 = vrot.lane.b32.xlu0 %v2359_v1, %s2257_s20 }
  0x25   : > { %571 = vrot.lane.b32.xlu1 %v2365_v2, %s2258_s21  ;;  %569 = vrot.lane.b32.xlu0 %v2359_v1, %s2258_s21 }
  0x29   : > { %744 = vrot.lane.b32.xlu1 %v2365_v2, %s2259_s22  ;;  %742 = vrot.lane.b32.xlu0 %v2359_v1, %s2259_s22 }
  0x2d   : > { %839 = vrot.lane.b32.xlu1 %v2365_v2, %s2260_s23  ;;  %837 = vrot.lane.b32.xlu0 %v2359_v1, %s2260_s23 }
  0x31   : > { %934 = vrot.lane.b32.xlu1 %v2365_v2, %s2261_s29  ;;  %932 = vrot.lane.b32.xlu0 %v2359_v1, %s2261_s29 }
  0x35   : > { %1029 = vrot.lane.b32.xlu1 %v2365_v2, %s2262_s8  ;;  %1027 = vrot.lane.b32.xlu0 %v2359_v1, %s2262_s8 }
  0x39   : > { %1125 = vperm.xlu0 %2189, %v1122_v3   ;;  %v2070_v3 = vld [vmem:[%s2761_s1 + $0x20] sm:$0xff] }
  0x8b   : > { %v287_v12 = vpop.permute.xlu1 %286  ;;  %v307_v13 = vpop.permute.xlu0 %306 }
  0x8f   : > { %v289_v19 = vpop.permute.xlu1 %288  ;;  %v309_v20 = vpop.permute.xlu0 %308 }
  0x90   : > { %v293_v21 = vsel %vm292_vm0, %v287_v12, %v289_v19  ;;  %v294_v22 = vsel %vm292_vm0, %v289_v19, %v287_v12  ;;  %v312_v23 = vsel %vm310_vm1, %v309_v20, %v307_v13  ;;  %v311_v24 = vsel %vm310_vm1, %v307_v13, %v309_v20  ;;  %v2072_v20 = vld [vmem:[%s2761_s1 + $0x28] sm:$0xff] }
  0x91   : > { %v304_v25 = vmul.f32 %v2417_v14, %v293_v21  ;;  %v322_v26 = vmul.f32 %v2420_v15, %v311_v24  ;;  %v321_v27 = vmul.f32 %v2423_v16, %v312_v23  ;;  %v303_v29 = vmul.f32 %v2427_v18, %v294_v22 }
  0x92   : > { %v2519_v12 = vrot.slane %v2407_v10, %v846_v56  ;;  %v2074_v10 = vld [vmem:[%s2761_s1 + $0x30] sm:$0xff] }
  0x93   : > { %329 = vmatprep.subr.mxu0 %v322_v26  ;;  %v477_v31 = vpop.permute.xlu1 %476  ;;  %v475_v32 = vpop.permute.xlu0 %474 }
  0x94   : > { %330 = vmatpush1.msra.mxu0 %v321_v27  ;;  %v479_v34 = vsel %vm478_vm2, %v475_v32, %v477_v31  ;;  %v480_v37 = vsel %vm478_vm2, %v477_v31, %v475_v32 }
  0x95   : > { %2064 = vmatmul.mubr.msk.f32.vlgmr.msra.gmra.mrb[0].mxu0 %vm325_vm3, %v2063_v30  ;;  %403 = vmatprep.subr.mxu0 %v304_v25  ;;  %v490_v35 = vmul.f32 %v2442_v28, %v479_v34  ;;  %v489_v42 = vmul.f32 %v2455_v36, %v480_v37  ;;  %v2545_v25 = vld [vmem:[%s2766_s6 + $0x18] ss:$0 sm:$0xff]  ;;  %v2559_v30 = vld [vmem:[%s2766_s6 + $0x10] ss:$0 sm:$0xff]  ;;  %v2080_v34 = vld [vmem:[%s2761_s1 + $0x40] sm:$0xff] }
  0x96   : > { %404 = vmatpush1.msra.mxu0 %v303_v29  ;;  %467 = vmatprep.mubr.f32.mxu0 %v2254_v0 }
  0x97   : > { %496 = vmatprep.subr.mxu0 %v490_v35  ;;  %v572_v38 = vpop.permute.xlu1 %571  ;;  %v570_v40 = vpop.permute.xlu0 %569 }
  0x98   : > { %v574_v41 = vsel %vm573_vm4, %v570_v40, %v572_v38  ;;  %v575_v46 = vsel %vm573_vm4, %v572_v38, %v570_v40 }
  0x99   : > { %v585_v44 = vmul.f32 %v2461_v39, %v574_v41  ;;  %v584_v47 = vmul.f32 %v2472_v45, %v575_v46 }
  0x9b   : > { %v745_v50 = vpop.permute.xlu1 %744  ;;  %v743_v51 = vpop.permute.xlu0 %742 }
  0x9c   : > { %v748_v53 = vsel %vm746_vm5, %v745_v50, %v743_v51  ;;  %v747_v60 = vsel %vm746_vm5, %v743_v51, %v745_v50 }
  0x9d   : > { %2065 = vmatmul.mubr.msk.f32.vlgmr.msra.gmra.mrb[0].mxu0 %vm325_vm3, %v305_v43  ;;  %v758_v55 = vmul.f32 %v2487_v52, %v748_v53  ;;  %v757_v63 = vmul.f32 %v2500_v59, %v747_v60  ;;  %v1141_v53 = vld [vmem:[%s2763_s3] sm:$0xff] }
  0x9e   : > { %497 = vmatpush1.msra.mxu0 %v489_v42  ;;  %560 = vmatprep.mubr.f32.mxu0 %v2254_v0 }
  0x9f   : > { %591 = vmatprep.subr.mxu0 %v585_v44  ;;  %v840_v57 = vpop.permute.xlu1 %839  ;;  %v838_v58 = vpop.permute.xlu0 %837  ;;  %v1970_v44 = vld [vmem:[%s2765_s5] sm:$0xff] }
  0xa0   : > { %v843_v62 = vsel %vm841_vm6, %v840_v57, %v838_v58  ;;  %v842_v13 = vsel %vm841_vm6, %v838_v58, %v840_v57 }
  0xa1   : > { %v853_v4 = vmul.f32 %v2506_v61, %v843_v62  ;;  %v852_v19 = vmul.f32 %v2519_v12, %v842_v13 }
  0xa3   : > { %v935_v8 = vpop.permute.xlu1 %934  ;;  %v933_v9 = vpop.permute.xlu0 %932 }
  0xa4   : > { %v938_v6 = vsel %vm936_vm7, %v935_v8, %v933_v9  ;;  %v937_v24 = vsel %vm936_vm7, %v933_v9, %v935_v8  ;;  %v2086_v9 = vld [vmem:[%s2763_s3 + $0x10] sm:$0xff] }
  0xa5   : > { %2067 = vmatmul.mubr.msk.f32.vlgmr.msra.gmra.mrb[0].mxu0 %vm325_vm3, %v2066_v48  ;;  %v948_v21 = vmul.f32 %v2525_v17, %v938_v6  ;;  %v947_v27 = vmul.f32 %v2537_v11, %v937_v24  ;;  %v2090_v24 = vld [vmem:[%s2763_s3 + $0x20] sm:$0xff] }
  0xa6   : > { %592 = vmatpush1.msra.mxu0 %v584_v47  ;;  %655 = vmatprep.mubr.f32.mxu0 %v2254_v0 }
  0xa7   : > { %669 = vmatprep.subr.mxu0 %v2365_v2  ;;  %v1030_v22 = vpop.permute.xlu1 %1029  ;;  %v1028_v23 = vpop.permute.xlu0 %1027 }
  0xa8   : > { %v1033_v26 = vsel %vm1031_vm8, %v1030_v22, %v1028_v23  ;;  %v1032_v31 = vsel %vm1031_vm8, %v1028_v23, %v1030_v22 }
  0xa9   : > { %v1043_v29 = vmul.f32 %v2545_v25, %v1033_v26  ;;  %v1042_v32 = vmul.f32 %v2559_v30, %v1032_v31 }
  0xad   : > { %2069 = vmatmul.mubr.msk.f32.vlgmr.msra.gmra.mrb[0].mxu0 %vm325_vm3, %v2068_v54 }
  0xae   : > { %670 = vmatpush1.msra.mxu0 %v2359_v1  ;;  %733 = vmatprep.mubr.f32.mxu0 %v2254_v0 }
  0xaf   : > { %764 = vmatprep.subr.mxu0 %v758_v55 }
  0xb5   : > { %2071 = vmatmul.mubr.msk.f32.vlgmr.msra.gmra.mrb[0].mxu0 %vm325_vm3, %v2070_v3 }
  0xb6   : > { %765 = vmatpush1.msra.mxu0 %v757_v63  ;;  %828 = vmatprep.mubr.f32.mxu0 %v2254_v0 }
  0xb7   : > { %859 = vmatprep.subr.mxu0 %v853_v4 }
  0xb8   : > { %v1126_v35 = vpop.permute.xlu0 %1125 }
  0xbd   : > { %2073 = vmatmul.mubr.msk.f32.vlgmr.msra.gmra.mrb[0].mxu0 %vm325_vm3, %v2072_v20 }
  0xbe   : > { %860 = vmatpush1.msra.mxu0 %v852_v19  ;;  %923 = vmatprep.mubr.f32.mxu0 %v2254_v0  ;;  %v2088_v19 = vld [vmem:[%s2763_s3 + $0x18] sm:$0xff] }
  0xbf   : > { %954 = vmatprep.subr.mxu0 %v948_v21 }
  0xc5   : > { %2075 = vmatmul.mubr.msk.f32.vlgmr.msra.gmra.mrb[0].mxu0 %vm325_vm3, %v2074_v10 }
  0xc6   : > { %955 = vmatpush1.msra.mxu0 %v947_v27  ;;  %1018 = vmatprep.mubr.f32.mxu0 %v2254_v0 }
  0xc7   : > { %1049 = vmatprep.subr.mxu0 %v1043_v29 }
  0xcd   : > { %2077 = vmatmul.mubr.msk.f32.vlgmr.msra.gmra.mrb[0].mxu0 %vm325_vm3, %v2076_v33 }
  0xce   : > { %1050 = vmatpush1.msra.mxu0 %v1042_v32  ;;  %1113 = vmatprep.mubr.f32.mxu0 %v2254_v0 }
  0xd5   : > { %2081 = vmatmul.mubr.msk.f32.vlgmr.msra.gmra.mrb[0].mxu0 %vm325_vm3, %v2080_v34 }
 0x1a8   : > { %v1115_v37 = vpop.f32.mrb[0].mxu0 }
 0x1a9   : > { %v1128_v38 = vadd.f32 %v1126_v35, %v1115_v37  ;;  %v1117_v40 = vpop.f32.mrb[1].mxu0 }
 0x1aa   : > { %v1129_v42 = vadd.f32 %v1126_v35, %v1117_v40 }
 0x1ab   : > { %v2573_v41 = vmax.f32 %v1128_v38, 0.0 }
 0x1ac   : > { %v2579_v43 = vmax.f32 %v1129_v42, 0.0 }
 0x1ad   : > { %1290 = vrot.lane.b32.xlu0 %v2573_v41, %s2256_s19  ;;  %1133 = vrot.lane.b32.xlu1 %v2573_v41, %s2255_s18 }
 0x1b1   : > { %1376 = vrot.lane.b32.xlu0 %v2573_v41, %s2257_s20  ;;  %1135 = vrot.lane.b32.xlu1 %v2579_v43, %s2255_s18 }
 0x1b5   : > { %1462 = vrot.lane.b32.xlu0 %v2573_v41, %s2258_s21  ;;  %1292 = vrot.lane.b32.xlu1 %v2579_v43, %s2256_s19  ;;  %s2718_s19 = scalar_lea.hbm %s2767_s7, %s2105_s9 }
 0x1b9   : > { %1626 = vrot.lane.b32.xlu0 %v2573_v41, %s2259_s22  ;;  %1378 = vrot.lane.b32.xlu1 %v2579_v43, %s2257_s20  ;;  %s1983_s20 = scalar_lea.sflag [#allocation3], %s270_s16 }
 0x1bd   : > { %1712 = vrot.lane.b32.xlu0 %v2573_v41, %s2260_s23  ;;  %1464 = vrot.lane.b32.xlu1 %v2579_v43, %s2258_s21  ;;  %s2190_s21 = scalar_lea.vmem %s2720_s14, 256 }
 0x1be   : > { %p2191_p11 = scmp.ne.s32.totalorder %s2720_s14, %s2190_s21 }
 0x1c0   : > { %p2192_p12 = pnand %p2191_p11, %p2343_p5 }
 0x1c1   : > { %1798 = vrot.lane.b32.xlu0 %v2573_v41, %s2261_s29  ;;  %1628 = vrot.lane.b32.xlu1 %v2579_v43, %s2259_s22  ;;  %s2194_s22 = sshll.u32 %s2264_s28, 4  ;;  %s2195_s22 = int_to_ptr.vmem [resolvable:$false] %s2194_s22 }
 0x1c2   : > { %p2193_p13 = pneg %p2192_p12  ;;  %p2197_p0 = scmp.lt.s32.totalorder %s2720_s14, %s2195_s22 }
 0x1c5   : > { %1884 = vrot.lane.b32.xlu0 %v2573_v41, %s2262_s8  ;;  %1714 = vrot.lane.b32.xlu1 %v2579_v43, %s2260_s23  ;;  %s2196_s23 = scalar_lea.vmem %s2195_s22, 512 }
 0x1c6   : > { %p2198_p1 = scmp.lt.s32.totalorder %s2196_s23, %s2190_s21 }
 0x1c8   : > { %p2199_p2 = por %p2198_p1, %p2197_p0 }
 0x1c9   : > { %1973 = vperm.xlu0 %2189, %v1970_v44   ;;  %1800 = vrot.lane.b32.xlu1 %v2579_v43, %s2261_s29 }
 0x1ca   : > { %p2200_p3 = pnand %p2199_p2, %p2193_p13 }
 0x1cd   : > { %1886 = vrot.lane.b32.xlu1 %v2579_v43, %s2262_s8 }
 0x21f   : > { %v1134_v46 = vpop.permute.xlu1 %1133  ;;  %v1291_v54 = vpop.permute.xlu0 %1290 }
 0x223   : > { %v1136_v47 = vpop.permute.xlu1 %1135 }
 0x224   : > { %v1138_v48 = vsel %vm292_vm0, %v1136_v47, %v1134_v46  ;;  %v1137_v49 = vsel %vm292_vm0, %v1134_v46, %v1136_v47 }
 0x225   : > { %v1140_v50 = vmul.f32 %v1137_v49, %v2417_v14  ;;  %v1139_v51 = vmul.f32 %v1138_v48, %v2427_v18  ;;  %v1377_v18 = vpop.permute.xlu0 %1376 }
 0x227   : > { %1145 = vmatprep.subr.mxu1 %v1140_v50  ;;  %v1293_v55 = vpop.permute.xlu1 %1292 }
 0x228   : > { %v1294_v56 = vsel %vm310_vm1, %v1291_v54, %v1293_v55  ;;  %1146 = vmatpush1.msra.mxu1 %v1139_v51  ;;  %v1295_v58 = vsel %vm310_vm1, %v1293_v55, %v1291_v54 }
 0x229   : > { %v1297_v57 = vmul.f32 %v1294_v56, %v2420_v15  ;;  %2082 = vmatmul.mubr.msk.f32.vlgmr.msra.gmra.mrb[0].mxu1 %vm325_vm3, %v1141_v53  ;;  %1219 = vmatprep.subr.mxu1 %v2365_v2  ;;  %v1132_v15 = vld [vmem:[%s2762_s2] sm:$0xff]  ;;  %v1296_v62 = vmul.f32 %v1295_v58, %v2423_v16  ;;  %v1463_v63 = vpop.permute.xlu0 %1462  ;;  %v2084_v16 = vld [vmem:[%s2763_s3 + $0x8] sm:$0xff] }
 0x22a   : > { %1220 = vmatpush1.msra.mxu1 %v2359_v1  ;;  %1283 = vmatprep.mubr.f32.mxu1 %v2254_v0 }
 0x22b   : > { %1303 = vmatprep.subr.mxu1 %v1297_v57  ;;  %v1379_v14 = vpop.permute.xlu1 %1378 }
 0x22c   : > { %v1380_v60 = vsel %vm478_vm2, %v1377_v18, %v1379_v14  ;;  %v1381_v3 = vsel %vm478_vm2, %v1379_v14, %v1377_v18 }
 0x22d   : > { %v1383_v2 = vmul.f32 %v1380_v60, %v2442_v28  ;;  %v1382_v28 = vmul.f32 %v1381_v3, %v2455_v36 }
 0x22f   : > { %v1465_v1 = vpop.permute.xlu1 %1464 }
 0x230   : > { %v1466_v4 = vsel %vm573_vm4, %v1463_v63, %v1465_v1  ;;  %v1467_v8 = vsel %vm573_vm4, %v1465_v1, %v1463_v63 }
 0x231   : > { %2083 = vmatmul.mubr.msk.f32.vlgmr.msra.gmra.mrb[0].mxu1 %vm325_vm3, %v1132_v15  ;;  %v1469_v5 = vmul.f32 %v1466_v4, %v2461_v39  ;;  %v1468_v13 = vmul.f32 %v1467_v8, %v2472_v45  ;;  %v1627_v39 = vpop.permute.xlu0 %1626 }
 0x232   : > { %1304 = vmatpush1.msra.mxu1 %v1296_v62  ;;  %1367 = vmatprep.mubr.f32.mxu1 %v2254_v0 }
 0x233   : > { %1389 = vmatprep.subr.mxu1 %v1383_v2  ;;  %v1629_v36 = vpop.permute.xlu1 %1628 }
 0x234   : > { %v1631_v6 = vsel %vm746_vm5, %v1629_v36, %v1627_v39  ;;  %v1630_v22 = vsel %vm746_vm5, %v1627_v39, %v1629_v36 }
 0x235   : > { %v1633_v20 = vmul.f32 %v1631_v6, %v2487_v52  ;;  %v1713_v21 = vpop.permute.xlu0 %1712  ;;  %v1632_v52 = vmul.f32 %v1630_v22, %v2500_v59  ;;  %v2092_v59 = vld [vmem:[%s2763_s3 + $0x28] sm:$0xff] }
 0x237   : > { %v1715_v45 = vpop.permute.xlu1 %1714 }
 0x238   : > { %v1717_v23 = vsel %vm841_vm6, %v1715_v45, %v1713_v21  ;;  %v1716_v29 = vsel %vm841_vm6, %v1713_v21, %v1715_v45 }
 0x239   : > { %2085 = vmatmul.mubr.msk.f32.vlgmr.msra.gmra.mrb[0].mxu1 %vm325_vm3, %v2084_v16  ;;  %v1719_v26 = vmul.f32 %v1717_v23, %v2506_v61  ;;  %v1799_v10 = vpop.permute.xlu0 %1798  ;;  %v1718_v61 = vmul.f32 %v1716_v29, %v2519_v12  ;;  %v2094_v12 = vld [vmem:[%s2763_s3 + $0x30] sm:$0xff] }
 0x23a   : > { %1390 = vmatpush1.msra.mxu1 %v1382_v28  ;;  %1453 = vmatprep.mubr.f32.mxu1 %v2254_v0 }
 0x23b   : > { %1475 = vmatprep.subr.mxu1 %v1469_v5  ;;  %v1801_v27 = vpop.permute.xlu1 %1800 }
 0x23c   : > { %v1803_v31 = vsel %vm936_vm7, %v1801_v27, %v1799_v10  ;;  %v1802_v35 = vsel %vm936_vm7, %v1799_v10, %v1801_v27 }
 0x23d   : > { %v1805_v32 = vmul.f32 %v1803_v31, %v2525_v17  ;;  %v1885_v34 = vpop.permute.xlu0 %1884  ;;  %v1804_v17 = vmul.f32 %v1802_v35, %v2537_v11  ;;  %v2098_v11 = vld [vmem:[%s2763_s3 + $0x40] sm:$0xff] }
 0x23f   : > { %v1887_v33 = vpop.permute.xlu1 %1886 }
 0x240   : > { %v1889_v37 = vsel %vm1031_vm8, %v1887_v33, %v1885_v34  ;;  %v1888_v40 = vsel %vm1031_vm8, %v1885_v34, %v1887_v33 }
 0x241   : > { %2087 = vmatmul.mubr.msk.f32.vlgmr.msra.gmra.mrb[0].mxu1 %vm325_vm3, %v2086_v9  ;;  %v1891_v38 = vmul.f32 %v2545_v25, %v1889_v37  ;;  %v1890_v42 = vmul.f32 %v2559_v30, %v1888_v40 }
 0x242   : > { %1476 = vmatpush1.msra.mxu1 %v1468_v13  ;;  %1539 = vmatprep.mubr.f32.mxu1 %v2254_v0 }
 0x243   : > { %1553 = vmatprep.subr.mxu1 %v2579_v43 }
 0x248   : > { %v1974_v7 = vpop.permute.xlu0 %1973 }
 0x249   : > { %2089 = vmatmul.mubr.msk.f32.vlgmr.msra.gmra.mrb[0].mxu1 %vm325_vm3, %v2088_v19 }
 0x24a   : > { %1554 = vmatpush1.msra.mxu1 %v2573_v41  ;;  %1617 = vmatprep.mubr.f32.mxu1 %v2254_v0  ;;  %v2096_v41 = vld [vmem:[%s2763_s3 + $0x38] sm:$0xff] }
 0x24b   : > { %1639 = vmatprep.subr.mxu1 %v1633_v20 }
 0x251   : > { %2091 = vmatmul.mubr.msk.f32.vlgmr.msra.gmra.mrb[0].mxu1 %vm325_vm3, %v2090_v24 }
 0x252   : > { %1640 = vmatpush1.msra.mxu1 %v1632_v52  ;;  %1703 = vmatprep.mubr.f32.mxu1 %v2254_v0 }
 0x253   : > { %1725 = vmatprep.subr.mxu1 %v1719_v26 }
 0x259   : > { %2093 = vmatmul.mubr.msk.f32.vlgmr.msra.gmra.mrb[0].mxu1 %vm325_vm3, %v2092_v59 }
 0x25a   : > { %1726 = vmatpush1.msra.mxu1 %v1718_v61  ;;  %1789 = vmatprep.mubr.f32.mxu1 %v2254_v0 }
 0x25b   : > { %1811 = vmatprep.subr.mxu1 %v1805_v32 }
 0x261   : > { %2095 = vmatmul.mubr.msk.f32.vlgmr.msra.gmra.mrb[0].mxu1 %vm325_vm3, %v2094_v12 }
 0x262   : > { %1812 = vmatpush1.msra.mxu1 %v1804_v17  ;;  %1875 = vmatprep.mubr.f32.mxu1 %v2254_v0 }
 0x263   : > { %1897 = vmatprep.subr.mxu1 %v1891_v38 }
 0x269   : > { %2097 = vmatmul.mubr.msk.f32.vlgmr.msra.gmra.mrb[0].mxu1 %vm325_vm3, %v2096_v41 }
 0x26a   : > { %1898 = vmatpush1.msra.mxu1 %v1890_v42  ;;  %1961 = vmatprep.mubr.f32.mxu1 %v2254_v0 }
 0x271   : > { %2099 = vmatmul.mubr.msk.f32.vlgmr.msra.gmra.mrb[0].mxu1 %vm325_vm3, %v2098_v11 }
 0x344   : > { %v1963_v25 = vpop.f32.mrb[0].mxu1 }
 0x345   : > { %v1976_v43 = vadd.f32 %v1974_v7, %v1963_v25  ;;  %v1965_v44 = vpop.f32.mrb[1].mxu1 }
 0x346   : > { %v1977_v30 = vadd.f32 %v1974_v7, %v1965_v44 }
 0x347   : > { %v1978_v46 = vmax.f32 %v1976_v43, 0.0 }
 0x348   : > { %v1979_v47 = vmax.f32 %v1977_v30, 0.0 }
 0x349   : > { %1980 = vst [vmem:[%s272_s13] sm:$0xff] %v1978_v46 }
 0x34a   : > { %1981 = vst [vmem:[%s272_s13 + $0x8] sm:$0xff] %v1979_v47 }
 0x34b   : > { %2203 = shalt.err (!%p2200_p3)
}
 0x34c   : > { %s2204_s29 = scalar_lea.hbm %s2718_s19, 256  ;;  %s2208_s17 = scalar_lea.hbm %s2767_s7, 512 }
 0x34d   : > { %p2205_p4 = scmp.ne.s32.totalorder %s2718_s19, %s2204_s29  ;;  %p2209_p9 = scmp.lt.u32.totalorder %s2718_s19, %s2767_s7 }
 0x34e   : > { %p2210_p10 = scmp.lt.u32.totalorder %s2208_s17, %s2204_s29  ;;  %p2212_p12 = scmp.lt.u32.totalorder %s2204_s29, %s2718_s19 }
 0x34f   : > { %p2206_p7 = pnand %p2205_p4, %p2343_p5 }
 0x350   : > { %p2211_p11 = por %p2210_p10, %p2209_p9 }
 0x351   : > { %p2207_p8 = pneg %p2206_p7 }
 0x352   : > { %p2213_p13 = por %p2212_p12, %p2211_p11 }
 0x354   : > { %p2214_p0 = pnand %p2213_p13, %p2207_p8 }
 0x356   : > { %2217 = shalt.err (!%p2214_p0)
}
 0x357   : > { %2140 = dma.vmem_to_hbm [thread:$0]  (%p2343_p5), %s2720_s14, 256, %s2718_s19, %s1983_s20  }
 0x358 PF: > { %p2146_p1 = scmp.ge.s32.totalorder %s2252_s27, 2  ;;  %s2009_s15 = sand.u32 1, %s2240_s24  }
 0x359   : > { %s2010_s18 = scalar_lea.sflag [#allocation3], %s2009_s15 }
 0x35a   : > { %p2143_p2 = pnand %p2146_p1, %p2347_p6 }
 0x35c   : > { %2235 = dma.done.wait (!%p2143_p2), %s2010_s18, 256  }
 0x35d   : > { %2237 = vsyncadd (!%p2143_p2), %s2010_s18, 4294967040  ;;  %p17_p3 = scmp.ge.s32.totalorder %s2330_s30, 4   ;;  %s2770_s24 = smov %s2244_s25 }
 0x35e   : > { %s2771_s25 = smov %s2248_s26  ;;  %s2772_s26 = smov %s2341_s10 }
 0x35f   : > { %s2773_s27 = smov %s2330_s30  ;;  %19 = sbr.rel (!%p17_p3) target bundleno = 3 (0x3), region = 99 }
 0x366   :  { %2015 = vsyncpa [#allocation3], 1 }
 0x367   :  { %2017 = vsyncpa [#allocation3 + $0x1], 1 }

</bundles_post_ra>
